<compile_context>
chip_gen: v6e
topology: v6e:2x2x1
jax: 0.10.0
libtpu: 0.0.40
codegen_flags: <defaults>
</compile_context>

<pallas_src>
import functools
import math

import jax
import jax.numpy as jnp
from jax import lax
from jax.experimental import pallas as pl
from jax.experimental.pallas import tpu as pltpu


# ----------------------------------------------------------------------------
# Kernel: tiled sum of squared differences into a vreg-shaped accumulator,
# finalize with a single cross-lane reduce and the 1/N scaling.
# ----------------------------------------------------------------------------
def _mse_kernel(pred_ref, targ_ref, o_ref, acc_ref, *,
                n_rows, tile_rows, n_cols, n_total, vreg_fold):
    i = pl.program_id(0)
    last = pl.num_programs(0) - 1

    @pl.when(i == 0)
    def _():
        acc_ref[...] = jnp.zeros_like(acc_ref)

    # target.float() semantics: do the elementwise math in f32 regardless of
    # input dtypes (required path on v5e, correct everywhere).
    diff = pred_ref[...].astype(jnp.float32) - targ_ref[...].astype(jnp.float32)
    sq = diff * diff

    if vreg_fold:
        # Pure VPU fold: group every 8 sublanes (tile-aligned reshape) and sum
        # across the vreg-batch axis -> (8, n_cols).  No XLU in steady state.
        def fold(x):
            return x.reshape(tile_rows // 8, 8, n_cols).sum(axis=0)
    else:
        # Small / odd-shaped single-step path: sublane reduce -> (1, n_cols).
        def fold(x):
            return jnp.sum(x, axis=0, keepdims=True)

    ragged = (n_rows % tile_rows) != 0
    if ragged:
        # Interior tiles: no masking work in the steady-state loop.
        @pl.when(i != last)
        def _():
            acc_ref[...] += fold(sq)

        # Last (ragged) tile only: mask padded rows (select, so NaN/Inf in the
        # pad region cannot leak), then accumulate.
        @pl.when(i == last)
        def _():
            row = i * tile_rows + lax.broadcasted_iota(jnp.int32, sq.shape, 0)
            acc_ref[...] += fold(jnp.where(row < n_rows, sq, 0.0))
    else:
        acc_ref[...] += fold(sq)

    # Finalize: one cross-lane/sublane reduce, divide by the true element
    # count, single (1, 1) store at the very end.
    @pl.when(i == last)
    def _():
        o_ref[...] = jnp.sum(acc_ref[...], keepdims=True) * (1.0 / n_total)


# ----------------------------------------------------------------------------
# Wrapper: mean((pred - target)^2) via a single pallas_call.
# ----------------------------------------------------------------------------
def mse_loss(pred, target, *,
             block_budget_bytes=4 * 1024 * 1024,
             vmem_limit_bytes=32 * 1024 * 1024):
    assert pred.shape == target.shape, "pred/target shape mismatch"
    n_total = math.prod(pred.shape) if pred.ndim > 0 else 1

    # ---- choose a lane-dense 2-D view (layout is free for a reduction) ----
    if n_total % 128 == 0:
        n_cols = 128
        for w in (2048, 1024, 512, 256):
            if n_total % w == 0:
                n_cols = w
                break
        pred2 = pred.reshape(-1, n_cols)
        targ2 = target.reshape(-1, n_cols)
    else:
        # Fallback: (rows, last-dim) view; last block dim equals the full
        # array dim so the (8,128) rule is satisfied.
        if pred.ndim == 1:
            pred2 = pred.reshape(1, -1)
            targ2 = target.reshape(1, -1)
        elif pred.ndim > 2:
            pred2 = pred.reshape(-1, pred.shape[-1])
            targ2 = target.reshape(-1, target.shape[-1])
        else:
            pred2, targ2 = pred, target
        n_cols = pred2.shape[1]
    n_rows = pred2.shape[0]

    # ---- byte-budgeted tile: ~block_budget_bytes per input per block -------
    # Pipeline footprint ~= 2 inputs x 2 buffers x block_bytes; with the 4 MiB
    # default budget that is ~16 MiB, within the 32 MiB vmem limit on all gens.
    itemsize = max(pred2.dtype.itemsize, targ2.dtype.itemsize)
    rows_fit = max(1, block_budget_bytes // (n_cols * itemsize))
    tile_rows = max(8, (rows_fit // 8) * 8)   # multiple of 8 (8,128) rule
    if tile_rows >= n_rows:
        tile_rows = n_rows                    # single step, full-dim block
    grid = (pl.cdiv(n_rows, tile_rows),)

    # Vreg-shaped accumulator when the tile is (8,128)-aligned; otherwise a
    # single lane-row accumulator (tiny single-step / odd-width cases).
    vreg_fold = (tile_rows % 8 == 0) and (n_cols % 128 == 0)
    acc_rows = 8 if vreg_fold else 1

    kernel = functools.partial(
        _mse_kernel,
        n_rows=n_rows, tile_rows=tile_rows, n_cols=n_cols,
        n_total=n_total, vreg_fold=vreg_fold)

    out = pl.pallas_call(
        kernel,
        out_shape=jax.ShapeDtypeStruct((1, 1), jnp.float32),
        grid=grid,
        in_specs=[
            pl.BlockSpec((tile_rows, n_cols), lambda i: (i, 0)),
            pl.BlockSpec((tile_rows, n_cols), lambda i: (i, 0)),
        ],
        # Accumulator-style output: same (0, 0) block across the whole
        # reduction axis, written only on the final step.
        out_specs=pl.BlockSpec((1, 1), lambda i: (0, 0)),
        scratch_shapes=[pltpu.VMEM((acc_rows, n_cols), jnp.float32)],
        compiler_params=pltpu.CompilerParams(
            dimension_semantics=("arbitrary",),     # reduction axis
            vmem_limit_bytes=vmem_limit_bytes),
    )(pred2, targ2)
    return out[0, 0]


# ----------------------------------------------------------------------------
# LossMSE container mirroring the PyTorch module.
# ----------------------------------------------------------------------------
class LossMSE:
    def __init__(self):
        self.pred = None
        self.target = None

    def forward(self, pred, target):
        self.pred = pred
        self.target = target            # stored raw, as in the reference
        return mse_loss(pred, target)

    def backward(self):
        # Matches the reference Proj2 module exactly: 2*(pred - target),
        # intentionally WITHOUT the 1/N mean factor (differs from nn.MSELoss).
        return 2.0 * (self.pred - self.target)

    def param(self):
        return []


if __name__ == "__main__":
    key = jax.random.PRNGKey(0)
    k_p, k_t, k_p2, k_t2, k_p3, k_t3 = jax.random.split(key, 6)

    # 1) Small lane-dense case (flat view, single grid step).
    batch, dim = 64, 128
    pred = jax.random.normal(k_p, (batch, dim), jnp.float32)
    target = jax.random.normal(k_t, (batch, dim), jnp.float32)

    loss_mod = LossMSE()
    out = loss_mod.forward(pred, target)
    out = jax.block_until_ready(out)
    ref = jnp.mean((pred - target) ** 2)
    assert out.shape == ()
    assert jnp.allclose(out, ref, atol=1e-5, rtol=1e-5), (out, ref)

    # 2) Multi-step + ragged-last-tile path (small block budget forces a
    #    grid > 1 with a masked tail while keeping the test shapes small).
    rows2, dim2 = 1300, 128
    pred2 = jax.random.normal(k_p2, (rows2, dim2), jnp.float32)
    target2 = jax.random.normal(k_t2, (rows2, dim2), jnp.float32)
    out2 = jax.block_until_ready(
        mse_loss(pred2, target2, block_budget_bytes=64 * 1024))
    ref2 = jnp.mean((pred2 - target2) ** 2)
    assert jnp.allclose(out2, ref2, atol=1e-5, rtol=1e-5), (out2, ref2)

    # 3) Odd shape (element count not a multiple of 128 -> fallback view).
    pred3 = jax.random.normal(k_p3, (7, 10), jnp.float32)
    target3 = jax.random.normal(k_t3, (7, 10), jnp.float32)
    out3 = jax.block_until_ready(mse_loss(pred3, target3))
    ref3 = jnp.mean((pred3 - target3) ** 2)
    assert jnp.allclose(out3, ref3, atol=1e-5, rtol=1e-5), (out3, ref3)

    print("KERNEL_OK")
</pallas_src>

<mosaic_0001>
module attributes {stable_mosaic.version = 11 : i64} {
  func.func @_mse_kernel(%arg0: i32, %arg1: memref<4x2048xf32, #tpu.memory_space<vmem>>, %arg2: memref<4x2048xf32, #tpu.memory_space<vmem>>, %arg3: memref<1x1xf32, #tpu.memory_space<vmem>>, %arg4: memref<1x2048xf32, #tpu.memory_space<vmem>>) attributes {dimension_semantics = [#tpu.dimension_semantics<arbitrary>], iteration_bounds = array<i64: 1>, scalar_prefetch = 0 : i64, scratch_operands = 1 : i64, tpu.core_type = #tpu.core_type<tc>, window_params = [{transform_indices = @transform_0, window_bounds = array<i64: 4, 2048>}, {transform_indices = @transform_1, window_bounds = array<i64: 4, 2048>}, {pipeline_mode = #tpu.pipeline_mode<synchronous>, transform_indices = @transform_2, window_bounds = array<i64: 1, 1>}]} {
    %c0_i32 = arith.constant 0 : i32
    %0 = arith.cmpi eq, %arg0, %c0_i32 : i32
    %1 = arith.extui %0 : i1 to i32
    %c0_i32_0 = arith.constant 0 : i32
    %2 = arith.cmpi ne, %1, %c0_i32_0 : i32
    scf.if %2 {
      %cst_10 = arith.constant 0.000000e+00 : f32
      %15 = vector.broadcast %cst_10 : f32 to vector<1x2048xf32>
      %c0_11 = arith.constant 0 : index
      %c0_12 = arith.constant 0 : index
      %16 = vector.load %arg4[%c0_11, %c0_12] : memref<1x2048xf32, #tpu.memory_space<vmem>>, vector<1x2048xf32>
      tpu.vector_store %arg4[%c0_11, %c0_12], %15 {strides = array<i32>} : memref<1x2048xf32, #tpu.memory_space<vmem>>, vector<1x2048xf32>,
    } else {
    }
    %c0 = arith.constant 0 : index
    %c0_1 = arith.constant 0 : index
    %3 = vector.load %arg1[%c0, %c0_1] : memref<4x2048xf32, #tpu.memory_space<vmem>>, vector<4x2048xf32>
    %c0_2 = arith.constant 0 : index
    %c0_3 = arith.constant 0 : index
    %4 = vector.load %arg2[%c0_2, %c0_3] : memref<4x2048xf32, #tpu.memory_space<vmem>>, vector<4x2048xf32>
    %5 = arith.subf %3, %4 : vector<4x2048xf32>
    %6 = arith.mulf %5, %5 : vector<4x2048xf32>
    %c0_4 = arith.constant 0 : index
    %c0_5 = arith.constant 0 : index
    %7 = vector.load %arg4[%c0_4, %c0_5] : memref<1x2048xf32, #tpu.memory_space<vmem>>, vector<1x2048xf32>
    %cst = arith.constant dense<0.000000e+00> : vector<2048xf32>
    %8 = vector.multi_reduction <add>, %6, %cst [0] : vector<4x2048xf32> to vector<2048xf32>
    %9 = vector.shape_cast %8 : vector<2048xf32> to vector<1x2048xf32>
    %10 = arith.addf %7, %9 : vector<1x2048xf32>
    %c0_6 = arith.constant 0 : index
    %c0_7 = arith.constant 0 : index
    %11 = vector.load %arg4[%c0_6, %c0_7] : memref<1x2048xf32, #tpu.memory_space<vmem>>, vector<1x2048xf32>
    tpu.vector_store %arg4[%c0_6, %c0_7], %10 {strides = array<i32>} : memref<1x2048xf32, #tpu.memory_space<vmem>>, vector<1x2048xf32>,
    %c0_i32_8 = arith.constant 0 : i32
    %12 = arith.cmpi eq, %arg0, %c0_i32_8 : i32
    %13 = arith.extui %12 : i1 to i32
    %c0_i32_9 = arith.constant 0 : i32
    %14 = arith.cmpi ne, %13, %c0_i32_9 : i32
    scf.if %14 {
      %c0_10 = arith.constant 0 : index
      %c0_11 = arith.constant 0 : index
      %15 = vector.load %arg4[%c0_10, %c0_11] : memref<1x2048xf32, #tpu.memory_space<vmem>>, vector<1x2048xf32>
      %16 = vector.shape_cast %15 : vector<1x2048xf32> to vector<1x1x2048xf32>
      %cst_12 = arith.constant dense<0.000000e+00> : vector<1xf32>
      %17 = vector.multi_reduction <add>, %16, %cst_12 [1, 2] : vector<1x1x2048xf32> to vector<1xf32>
      %18 = vector.shape_cast %17 : vector<1xf32> to vector<1x1x1xf32>
      %19 = vector.extract %18[0, 0, 0] : f32 from vector<1x1x1xf32>
      %20 = vector.broadcast %19 : f32 to vector<1x1xf32>
      %cst_13 = arith.constant 1.22070313E-4 : f32
      %21 = vector.broadcast %cst_13 : f32 to vector<1x1xf32>
      %22 = arith.mulf %20, %21 : vector<1x1xf32>
      %c0_14 = arith.constant 0 : index
      %c0_15 = arith.constant 0 : index
      %23 = vector.load %arg3[%c0_14, %c0_15] : memref<1x1xf32, #tpu.memory_space<vmem>>, vector<1x1xf32>
      tpu.vector_store %arg3[%c0_14, %c0_15], %22 {strides = array<i32>} : memref<1x1xf32, #tpu.memory_space<vmem>>, vector<1x1xf32>,
    } else {
    }
    return
  }
  func.func @transform_0(%arg0: i32) -> (i32, i32) {
    %c0_i32 = arith.constant 0 : i32
    %c0_i32_0 = arith.constant 0 : i32
    return %arg0, %c0_i32 : i32, i32
  }
  func.func @transform_1(%arg0: i32) -> (i32, i32) {
    %c0_i32 = arith.constant 0 : i32
    %c0_i32_0 = arith.constant 0 : i32
    return %arg0, %c0_i32 : i32, i32
  }
  func.func @transform_2(%arg0: i32) -> (i32, i32) {
    %c0_i32 = arith.constant 0 : i32
    %c0_i32_0 = arith.constant 0 : i32
    %c0_i32_1 = arith.constant 0 : i32
    return %c0_i32, %c0_i32_0 : i32, i32
  }
}

</mosaic_0001>

<bundles_post_ra>
// kernel: tpu_custom_call.1
= control target key start
LH: loop header
LB: loop body
LE: loop exit
PB: predicated region body
PF: predicated region fallthrough
CT: control target
= control target key end

     0   :  { %7 = vsyncpa [#allocation4], 0  ;;  %s685_s0 = inlined_call_operand.hbm [shape: f32[4,2048], index: 0, kind: input, shape index: {}]   ;;  %s686_s1 = inlined_call_operand.hbm [shape: f32[4,2048], index: 1, kind: input, shape index: {}]   ;;  %s687_s2 = inlined_call_operand.hbm [shape: f32[1,1], index: 2, kind: output, shape index: {}]  }
   0x1   :  { %8 = vsyncpa [#allocation7], 0 }
   0x2   :  { %9 = vsyncpa [#allocation5], 0  ;;  %s553_s9 = smov [#allocation3]   ;;  %s554_s11 = smov [#allocation6]  }
   0x3   :  { %s16_s10 = sshll.u32 %s553_s9, 4  ;;  %s26_s12 = sshll.u32 %s554_s11, 4  ;;  %s17_s10 = int_to_ptr.vmem [resolvable:$true] %s16_s10  ;;  %s27_s12 = int_to_ptr.vmem [resolvable:$true] %s26_s12 }
   0x4   :  { %s495_s13 = scalar_lea.vmem %s17_s10, 1024  ;;  %p500_p1 = scmp.lt.s32.totalorder %s17_s10, %s17_s10 }
   0x5   :  { %p496_p0 = scmp.ne.s32.totalorder %s17_s10, %s495_s13  ;;  %p501_p2 = scmp.lt.s32.totalorder %s495_s13, %s495_s13 }
   0x7   :  { %p502_p3 = por %p501_p2, %p500_p1 }
   0x9   :  { %p503_p4 = pnand %p502_p3, %p496_p0 }
   0xb   :  { %506 = shalt.err (!%p503_p4)
}
   0xc   :  { %19 = dma.hbm_to_vmem [thread:$0]  %s685_s0, 1024, %s17_s10, [#allocation4]  }
   0xd   :  { %s515_s16 = scalar_lea.vmem %s27_s12, 1024  ;;  %p520_p6 = scmp.lt.s32.totalorder %s27_s12, %s27_s12 }
   0xe   :  { %p516_p5 = scmp.ne.s32.totalorder %s27_s12, %s515_s16  ;;  %p521_p7 = scmp.lt.s32.totalorder %s515_s16, %s515_s16 }
  0x10   :  { %p522_p8 = por %p521_p7, %p520_p6 }
  0x12   :  { %p523_p9 = pnand %p522_p8, %p516_p5 }
  0x14   :  { %526 = shalt.err (!%p523_p9)
}
  0x15   :  { %29 = dma.hbm_to_vmem [thread:$0]  %s686_s1, 1024, %s27_s12, [#allocation7]  }
  0x16   :  { %547 = dma.done.wait [#allocation4], 1024  }
  0x17   :  { %548 = vsyncadd [#allocation4], 4294966272 }
  0x18   :  { %549 = dma.done.wait [#allocation7], 1024  }
  0x19   :  { %550 = vsyncadd [#allocation7], 4294966272  ;;  %v555_v0 = vmov 1966171168   ;;  %v236_v2 = vlaneseq  ;;  %v42_v3 = vld [vmem:[#allocation3] sm:$0xff]  ;;  %v43_v4 = vld [vmem:[#allocation3 + $0x8] sm:$0xff] }
  0x1a   :  { %v234_v1 = vunpack.c.l.s4 %v555_v0  ;;  %v44_v5 = vld [vmem:[#allocation3 + $0x10] sm:$0xff]  ;;  %v45_v8 = vld [vmem:[#allocation3 + $0x18] sm:$0xff]  ;;  %v46_v9 = vld [vmem:[#allocation3 + $0x20] sm:$0xff]  ;;  %vm100_vm0 = vcmask 1043456   ;;  %vm420_vm1 = vcmask 1040384   ;;  %s556_s0 = smov [#allocation8]  }
  0x1b   :  { %v578_v7 = vshrl.u32 %v236_v2, 7  ;;  %v47_v10 = vld [vmem:[#allocation3 + $0x28] sm:$0xff]  ;;  %v48_v11 = vld [vmem:[#allocation3 + $0x30] sm:$0xff]  ;;  %v49_v12 = vld [vmem:[#allocation3 + $0x38] sm:$0xff]  ;;  %s471_s1 = sshll.u32 %s556_s0, 4  ;;  %vm463_vm2 = vcmask 0   ;;  %s472_s1 = int_to_ptr.vmem [resolvable:$true] %s471_s1 }
  0x1c   :  { %v235_v6 = vunpack.c.0.s8 %v234_v1  ;;  %v50_v13 = vld [vmem:[#allocation6] sm:$0xff]  ;;  %v51_v14 = vld [vmem:[#allocation6 + $0x8] sm:$0xff]  ;;  %v52_v15 = vld [vmem:[#allocation6 + $0x10] sm:$0xff]  ;;  %s527_s20 = scalar_lea.vmem %s472_s1, 16  ;;  %s531_s21 = scalar_lea.vmem %s472_s1, 32 }
  0x1d   :  { %v53_v16 = vld [vmem:[#allocation6 + $0x18] sm:$0xff]  ;;  %v58_v17 = vsub.f32 %v42_v3, %v50_v13  ;;  %v54_v18 = vld [vmem:[#allocation6 + $0x20] sm:$0xff]  ;;  %v55_v19 = vld [vmem:[#allocation6 + $0x28] sm:$0xff]  ;;  %v59_v21 = vsub.f32 %v43_v4, %v51_v14  ;;  %v60_v22 = vsub.f32 %v44_v5, %v52_v15  ;;  %p528_p10 = scmp.ne.s32.totalorder %s472_s1, %s527_s20  ;;  %p532_p11 = scmp.lt.s32.totalorder %s472_s1, %s472_s1 }
  0x1e   :  { %v56_v20 = vld [vmem:[#allocation6 + $0x30] sm:$0xff]  ;;  %v61_v23 = vsub.f32 %v45_v8, %v53_v16  ;;  %v581_v24 = vsub.s32 %v235_v6, %v578_v7  ;;  %v57_v25 = vld [vmem:[#allocation6 + $0x38] sm:$0xff]  ;;  %v62_v26 = vsub.f32 %v46_v9, %v54_v18  ;;  %v63_v27 = vsub.f32 %v47_v10, %v55_v19  ;;  %p533_p12 = scmp.lt.s32.totalorder %s531_s21, %s527_s20 }
  0x1f   :  { %v64_v28 = vsub.f32 %v48_v11, %v56_v20  ;;  %v66_v29 = vmul.f32 %v58_v17, %v58_v17  ;;  %v65_v30 = vsub.f32 %v49_v12, %v57_v25  ;;  %v67_v31 = vmul.f32 %v59_v21, %v59_v21 }
  0x20   :  { %v68_v32 = vmul.f32 %v60_v22, %v60_v22  ;;  %v69_v33 = vmul.f32 %v61_v23, %v61_v23  ;;  %v583_v34 = vmul.f32 %v62_v26, %v62_v26  ;;  %v585_v35 = vmul.f32 %v63_v27, %v63_v27  ;;  %p534_p13 = por %p533_p12, %p532_p11 }
  0x21   :  { %v587_v36 = vmul.f32 %v64_v28, %v64_v28  ;;  %v84_v37 = vcombine.high %v66_v29, %v66_v29  ;;  %v589_v38 = vmul.f32 %v65_v30, %v65_v30  ;;  %v85_v39 = vcombine.high %v67_v31, %v67_v31 }
  0x22   :  { %v86_v40 = vcombine.high %v68_v32, %v68_v32  ;;  %v87_v41 = vcombine.high %v69_v33, %v69_v33  ;;  %v88_v42 = vcombine.high %v583_v34, %v583_v34  ;;  %v89_v43 = vcombine.high %v585_v35, %v585_v35  ;;  %p535_p0 = pnand %p534_p13, %p528_p10 }
  0x23   :  { %v90_v44 = vcombine.high %v587_v36, %v587_v36  ;;  %v101_v45 = vsel %vm100_vm0, %v66_v29, 0.0  ;;  %v91_v46 = vcombine.high %v589_v38, %v589_v38  ;;  %v108_v48 = vsel %vm100_vm0, %v84_v37, 0.0 }
  0x24   :  { %v102_v47 = vrot.slane %v101_v45, 4  ;;  %v115_v49 = vsel %vm100_vm0, %v67_v31, 0.0  ;;  %v109_v50 = vrot.slane %v108_v48, 4  ;;  %v122_v52 = vsel %vm100_vm0, %v85_v39, 0.0 }
  0x25   :  { %v116_v51 = vrot.slane %v115_v49, 4  ;;  %v129_v53 = vsel %vm100_vm0, %v68_v32, 0.0  ;;  %v123_v55 = vrot.slane %v122_v52, 4  ;;  %v136_v57 = vsel %vm100_vm0, %v86_v40, 0.0 }
  0x26   :  { %v103_v54 = vadd.f32 %v102_v47, %v101_v45  ;;  %v130_v56 = vrot.slane %v129_v53, 4  ;;  %v110_v58 = vadd.f32 %v109_v50, %v108_v48  ;;  %v137_v60 = vrot.slane %v136_v57, 4 }
  0x27   :  { %v117_v59 = vadd.f32 %v116_v51, %v115_v49  ;;  %v143_v61 = vsel %vm100_vm0, %v69_v33, 0.0  ;;  %v124_v63 = vadd.f32 %v123_v55, %v122_v52  ;;  %v150_v5 = vsel %vm100_vm0, %v87_v41, 0.0 }
  0x28   :  { %v104_v62 = vrot.slane %v103_v54, 2  ;;  %v131_v0 = vadd.f32 %v130_v56, %v129_v53  ;;  %v144_v1 = vrot.slane %v143_v61, 4  ;;  %v111_v2 = vrot.slane %v110_v58, 2 }
  0x29   :  { %v118_v3 = vrot.slane %v117_v59, 2  ;;  %v138_v4 = vadd.f32 %v137_v60, %v136_v57  ;;  %v125_v8 = vrot.slane %v124_v63, 2  ;;  %v151_v14 = vrot.slane %v150_v5, 4 }
  0x2a   :  { %v105_v6 = vadd.f32 %v104_v62, %v103_v54  ;;  %v132_v9 = vrot.slane %v131_v0, 2  ;;  %v145_v10 = vadd.f32 %v144_v1, %v143_v61  ;;  %v112_v11 = vadd.f32 %v111_v2, %v110_v58 }
  0x2b   :  { %v119_v12 = vadd.f32 %v118_v3, %v117_v59  ;;  %v139_v13 = vrot.slane %v138_v4, 2  ;;  %v126_v16 = vadd.f32 %v125_v8, %v124_v63  ;;  %v152_v22 = vadd.f32 %v151_v14, %v150_v5 }
  0x2c   :  { %v106_v15 = vrot.slane %v105_v6, 1  ;;  %v133_v17 = vadd.f32 %v132_v9, %v131_v0  ;;  %v146_v18 = vrot.slane %v145_v10, 2  ;;  %v113_v19 = vrot.slane %v112_v11, 1 }
  0x2d   :  { %v120_v20 = vrot.slane %v119_v12, 1  ;;  %v140_v21 = vadd.f32 %v139_v13, %v138_v4  ;;  %v127_v25 = vrot.slane %v126_v16, 1  ;;  %v153_v31 = vrot.slane %v152_v22, 2 }
  0x2e   :  { %v607_v23 = vadd.f32 %v106_v15, %v105_v6  ;;  %v134_v26 = vrot.slane %v133_v17, 1  ;;  %v147_v27 = vadd.f32 %v146_v18, %v145_v10  ;;  %v609_v28 = vadd.f32 %v113_v19, %v112_v11 }
  0x2f   :  { %v611_v29 = vadd.f32 %v120_v20, %v119_v12  ;;  %v141_v30 = vrot.slane %v140_v21, 1  ;;  %v613_v32 = vadd.f32 %v127_v25, %v126_v16  ;;  %v157_v39 = vsel %vm100_vm0, %v583_v34, 0.0 }
  0x30   :  { %v615_v33 = vadd.f32 %v134_v26, %v133_v17  ;;  %v148_v37 = vrot.slane %v147_v27, 1  ;;  %v154_v41 = vadd.f32 %v153_v31, %v152_v22  ;;  %v158_v45 = vrot.slane %v157_v39, 4 }
  0x31   :  { %v619_v40 = vadd.f32 %v141_v30, %v140_v21  ;;  %v164_v47 = vsel %vm100_vm0, %v88_v42, 0.0  ;;  %v171_v50 = vsel %vm100_vm0, %v585_v35, 0.0  ;;  %v178_v51 = vsel %vm100_vm0, %v89_v43, 0.0 }
  0x32   :  { %v622_v48 = vadd.f32 %v148_v37, %v147_v27  ;;  %v165_v49 = vrot.slane %v164_v47, 4  ;;  %v155_v52 = vrot.slane %v154_v41, 1  ;;  %v159_v53 = vadd.f32 %v158_v45, %v157_v39 }
  0x33   :  { %v172_v54 = vrot.slane %v171_v50, 4  ;;  %v179_v55 = vrot.slane %v178_v51, 4  ;;  %v185_v34 = vsel %vm100_vm0, %v587_v36, 0.0  ;;  %v192_v42 = vsel %vm100_vm0, %v90_v44, 0.0 }
  0x34   :  { %v166_v56 = vadd.f32 %v165_v49, %v164_v47  ;;  %v199_v57 = vsel %vm100_vm0, %v589_v38, 0.0  ;;  %v156_v58 = vadd.f32 %v155_v52, %v154_v41  ;;  %v160_v35 = vrot.slane %v159_v53, 2 }
  0x35   :  { %v173_v59 = vadd.f32 %v172_v54, %v171_v50  ;;  %v180_v43 = vadd.f32 %v179_v55, %v178_v51  ;;  %v186_v61 = vrot.slane %v185_v34, 4  ;;  %v193_v62 = vrot.slane %v192_v42, 4 }
  0x36   :  { %v167_v60 = vrot.slane %v166_v56, 2  ;;  %v200_v63 = vrot.slane %v199_v57, 4  ;;  %v161_v0 = vadd.f32 %v160_v35, %v159_v53  ;;  %v206_v36 = vsel %vm100_vm0, %v91_v46, 0.0 }
  0x37   :  { %v174_v1 = vrot.slane %v173_v59, 2  ;;  %v181_v2 = vrot.slane %v180_v43, 2  ;;  %v187_v3 = vadd.f32 %v186_v61, %v185_v34  ;;  %v194_v4 = vadd.f32 %v193_v62, %v192_v42 }
  0x38   :  { %v168_v44 = vadd.f32 %v167_v60, %v166_v56  ;;  %v201_v5 = vadd.f32 %v200_v63, %v199_v57  ;;  %v162_v6 = vrot.slane %v161_v0, 1  ;;  %v207_v10 = vrot.slane %v206_v36, 4 }
  0x39   :  { %v175_v8 = vadd.f32 %v174_v1, %v173_v59  ;;  %v182_v9 = vadd.f32 %v181_v2, %v180_v43  ;;  %v188_v12 = vrot.slane %v187_v3, 2  ;;  %v195_v13 = vrot.slane %v194_v4, 2 }
  0x3a   :  { %v169_v11 = vrot.slane %v168_v44, 1  ;;  %v202_v14 = vrot.slane %v201_v5, 2  ;;  %v163_v15 = vadd.f32 %v162_v6, %v161_v0  ;;  %v208_v18 = vadd.f32 %v207_v10, %v206_v36 }
  0x3b   :  { %v176_v16 = vrot.slane %v175_v8, 1  ;;  %v183_v17 = vrot.slane %v182_v9, 1  ;;  %v189_v38 = vadd.f32 %v188_v12, %v187_v3  ;;  %v196_v20 = vadd.f32 %v195_v13, %v194_v4 }
  0x3c   :  { %v170_v19 = vadd.f32 %v169_v11, %v168_v44  ;;  %v203_v46 = vadd.f32 %v202_v14, %v201_v5  ;;  %v209_v25 = vrot.slane %v208_v18, 2  ;;  %v229_v26 = vcombine.low %v607_v23, %v609_v28 }
  0x3d   :  { %v177_v21 = vadd.f32 %v176_v16, %v175_v8  ;;  %v184_v22 = vadd.f32 %v183_v17, %v182_v9  ;;  %v190_v27 = vrot.slane %v189_v38, 1  ;;  %v197_v30 = vrot.slane %v196_v20, 1 }
  0x3e   :  { %v204_v31 = vrot.slane %v203_v46, 1  ;;  %v230_v37 = vcombine.low %v611_v29, %v613_v32  ;;  %v210_v39 = vadd.f32 %v209_v25, %v208_v18  ;;  %v231_v41 = vcombine.low %v615_v33, %v619_v40 }
  0x3f   :  { %v232_v45 = vcombine.low %v622_v48, %v156_v58  ;;  %v239_v47 = vrot.slane %v229_v26, %v581_v24  ;;  %v191_v49 = vadd.f32 %v190_v27, %v189_v38  ;;  %v198_v50 = vadd.f32 %v197_v30, %v196_v20 }
  0x40   :  { %v205_v51 = vadd.f32 %v204_v31, %v203_v46  ;;  %v246_v52 = vrot.slane %v230_v37, %v581_v24  ;;  %v211_v23 = vrot.slane %v210_v39, 1  ;;  %v253_v28 = vrot.slane %v231_v41, %v581_v24 }
  0x41   :  { %v260_v53 = vrot.slane %v232_v45, %v581_v24  ;;  %v278_v54 = vcombine.low %v163_v15, %v170_v19  ;;  %v279_v32 = vcombine.low %v177_v21, %v184_v22  ;;  %v280_v55 = vcombine.low %v191_v49, %v198_v50 }
  0x42   :  { %v261_v29 = vcombine.low %v239_v47, %v246_v52  ;;  %v212_v56 = vadd.f32 %v211_v23, %v210_v39  ;;  %v342_v42 = vsub.s32 0, %v578_v7  ;;  %v346_v57 = vsub.s32 1, %v578_v7 }
  0x43   :  { %v262_v33 = vcombine.low %v253_v28, %v260_v53  ;;  %v288_v40 = vrot.slane %v278_v54, %v581_v24  ;;  %v295_v34 = vrot.slane %v279_v32, %v581_v24  ;;  %v302_v59 = vrot.slane %v280_v55, %v581_v24 }
  0x44   :  { %v269_v48 = vrot.slane %v261_v29, %v581_v24  ;;  %v281_v35 = vcombine.low %v205_v51, %v212_v56  ;;  %v350_v43 = vsub.s32 2, %v578_v7  ;;  %v354_v60 = vsub.s32 3, %v578_v7 }
  0x45   :  { %v276_v58 = vrot.slane %v262_v33, %v581_v24  ;;  %v310_v63 = vcombine.low %v288_v40, %v295_v34  ;;  %v358_v0 = vsub.s32 4, %v578_v7  ;;  %v362_v4 = vsub.s32 5, %v578_v7 }
  0x46   :  { %v309_v62 = vrot.slane %v281_v35, %v581_v24  ;;  %v366_v6 = vsub.s32 6, %v578_v7  ;;  %v370_v15 = vsub.s32 7, %v578_v7 }
  0x47   :  { %v277_v61 = vcombine.low %v269_v48, %v276_v58  ;;  %v318_v5 = vrot.slane %v310_v63, %v581_v24 }
  0x48   :  { %v311_v1 = vcombine.low %v302_v59, %v309_v62 }
  0x49   :  { %v343_v2 = vrot.slane %v277_v61, %v342_v42  ;;  %v347_v36 = vrot.slane %v277_v61, %v346_v57  ;;  %v351_v44 = vrot.slane %v277_v61, %v350_v43  ;;  %v355_v3 = vrot.slane %v277_v61, %v354_v60 }
  0x4a   :  { %v325_v10 = vrot.slane %v311_v1, %v581_v24  ;;  %v359_v11 = vrot.slane %v277_v61, %v358_v0  ;;  %v363_v14 = vrot.slane %v277_v61, %v362_v4  ;;  %v367_v19 = vrot.slane %v277_v61, %v366_v6 }
  0x4b   :  { %v421_v8 = vsel %vm420_vm1, %v343_v2, 0.0  ;;  %v422_v9 = vsel %vm420_vm1, %v347_v36, 0.0  ;;  %v424_v13 = vsel %vm420_vm1, %v351_v44, 0.0  ;;  %v426_v17 = vsel %vm420_vm1, %v355_v3, 0.0 }
  0x4c   :  { %v423_v12 = vadd.f32 %v422_v9, %v421_v8  ;;  %v326_v18 = vcombine.low %v318_v5, %v325_v10  ;;  %v428_v38 = vsel %vm420_vm1, %v359_v11, 0.0  ;;  %v371_v46 = vrot.slane %v277_v61, %v370_v15 }
  0x4d   :  { %v430_v21 = vsel %vm420_vm1, %v363_v14, 0.0  ;;  %v432_v25 = vsel %vm420_vm1, %v367_v19, 0.0 }
  0x4e   :  { %v425_v16 = vadd.f32 %v424_v13, %v423_v12  ;;  %v375_v24 = vrot.slane %v326_v18, %v342_v42  ;;  %v379_v27 = vrot.slane %v326_v18, %v346_v57  ;;  %v434_v30 = vsel %vm420_vm1, %v371_v46, 0.0 }
  0x4f   :  { %v383_v31 = vrot.slane %v326_v18, %v350_v43  ;;  %v387_v41 = vrot.slane %v326_v18, %v354_v60  ;;  %v391_v49 = vrot.slane %v326_v18, %v358_v0  ;;  %v395_v52 = vrot.slane %v326_v18, %v362_v4 }
  0x50   :  { %v427_v20 = vadd.f32 %v426_v17, %v425_v16  ;;  %v436_v37 = vsel %vm420_vm1, %v375_v24, 0.0  ;;  %v438_v45 = vsel %vm420_vm1, %v379_v27, 0.0  ;;  %v399_v53 = vrot.slane %v326_v18, %v366_v6 }
  0x51   :  { %v440_v50 = vsel %vm420_vm1, %v383_v31, 0.0  ;;  %v442_v23 = vsel %vm420_vm1, %v387_v41, 0.0  ;;  %v444_v54 = vsel %vm420_vm1, %v391_v49, 0.0  ;;  %v403_v32 = vrot.slane %v326_v18, %v370_v15 }
  0x52   :  { %v429_v22 = vadd.f32 %v428_v38, %v427_v20  ;;  %v446_v55 = vsel %vm420_vm1, %v395_v52, 0.0  ;;  %v448_v33 = vsel %vm420_vm1, %v399_v53, 0.0 }
  0x53   :  { %v450_v48 = vsel %vm420_vm1, %v403_v32, 0.0 }
  0x54   :  { %v431_v26 = vadd.f32 %v430_v21, %v429_v22 }
  0x56   :  { %v433_v7 = vadd.f32 %v432_v25, %v431_v26 }
  0x58   :  { %v435_v39 = vadd.f32 %v434_v30, %v433_v7 }
  0x5a   :  { %v437_v47 = vadd.f32 %v436_v37, %v435_v39 }
  0x5c   :  { %v439_v51 = vadd.f32 %v438_v45, %v437_v47 }
  0x5e   :  { %v441_v28 = vadd.f32 %v440_v50, %v439_v51 }
  0x60   :  { %v443_v29 = vadd.f32 %v442_v23, %v441_v28 }
  0x62   :  { %v445_v56 = vadd.f32 %v444_v54, %v443_v29 }
  0x64   :  { %v447_v40 = vadd.f32 %v446_v55, %v445_v56 }
  0x66   :  { %v449_v34 = vadd.f32 %v448_v33, %v447_v40 }
  0x68   :  { %v451_v42 = vadd.f32 %v450_v48, %v449_v34 }
  0x6a   :  { %452 = vadd.xlane.f32.xlu0 %v451_v42 }
  0xf3   :  { %v453_v57 = vpop.xlane.xlu0 %452 }
  0xf4   :  { %v454_v58 = vrot.slane %v453_v57, 4 }
  0xf6   :  { %v455_v35 = vadd.f32 %v454_v58, %v453_v57 }
  0xf8   :  { %v456_v59 = vrot.slane %v455_v35, 2 }
  0xfa   :  { %v457_v43 = vadd.f32 %v456_v59, %v455_v35 }
  0xfc   :  { %v458_v60 = vrot.slane %v457_v43, 1 }
  0xfe   :  { %v459_v61 = vadd.f32 %v458_v60, %v457_v43 }
 0x100   :  { %481 = vpush %v459_v61 }
 0x131   :  { %s482_s19 = spop %481 }
 0x132   :  { %v461_v62 = vstv %s482_s19 }
 0x133   :  { %v462_v63 = vmul.f32 0.00012207031, %v461_v62 }
 0x135   :  { %464 = vst.msk [vmem:[#allocation8] sm:$0x1] %vm463_vm2, %v462_v63 }
 0x136   :  { %538 = shalt.err (!%p535_p0)
}
 0x137   :  { %474 = dma.vmem_to_hbm [thread:$0]  %s472_s1, 16, %s687_s2, [#allocation5]  }
 0x138   :  { %551 = dma.done.wait [#allocation5], 16  }
 0x139   :  { %552 = vsyncadd [#allocation5], 4294967280 }
 0x13a   :  { %478 = vsyncpa [#allocation4], 1 }
 0x13b   :  { %479 = vsyncpa [#allocation7], 1 }
 0x13c   :  { %480 = vsyncpa [#allocation5], 1 }

</bundles_post_ra>
